<compile_context>
chip_gen: v6e
topology: v6e:2x2x1
jax: 0.10.0
libtpu: 0.0.40
codegen_flags: <defaults>
</compile_context>

<pallas_src>
import functools
import math

import jax
import jax.numpy as jnp
from jax.experimental import pallas as pl
from jax.experimental.pallas import tpu as pltpu


def seplus_kernel(q_ref, k_ref, w_ref, b_ref, o_ref, *, spatial):
    """One batch element.

    q_ref : (1, Cq, H*W)        input dtype (f32)
    k_ref : (1, Ck, H*W)
    w_ref : (Cout, 9*Cq*Ck)     bf16
    b_ref : (Cout, 1)           f32
    o_ref : (1, Cout, H*W)
    """
    h, w = spatial
    _, cq, hw = q_ref.shape
    ck = k_ref.shape[1]
    c = cq * ck

    q2 = q_ref[0]                        # (Cq, HW)  lane-dense
    k2 = k_ref[0]                        # (Ck, HW)

    # ---- outer product: feat[i*Ck + j, s] = q[i, s] * k[j, s] --------------
    # Built as a single value (Cq lane-dense broadcast multiplies concatenated
    # along sublanes): no masked/strided stores and no full-slab zero pass.
    # Elementwise math stays in f32 (v5e has no bf16 VPU); cast to bf16 only
    # at the matmul input to halve VMEM traffic and hit the bf16 MXU rate.
    feat = jnp.concatenate(
        [q2[i:i + 1, :] * k2 for i in range(cq)], axis=0
    ).astype(jnp.bfloat16)               # (C, HW)

    # ---- im2col: 9 spatially shifted copies stacked along the K axis -------
    # Spatial is flattened on the lane axis, so conv tap (dy, dx) is a lane
    # shift by dy*W + dx with zero fill at the ends, plus a mask on the W
    # boundary columns (together this reproduces padding=1 exactly).
    x_idx = jax.lax.broadcasted_iota(jnp.int32, (1, hw), 1) % w
    mask_l = x_idx >= 1                  # valid lanes for dx = -1
    mask_r = x_idx <= w - 2              # valid lanes for dx = +1

    taps = []
    for dy in (-1, 0, 1):
        for dx in (-1, 0, 1):
            off = dy * w + dx
            if off > 0:
                shifted = jnp.concatenate(
                    [feat[:, off:], jnp.zeros((c, off), feat.dtype)], axis=1)
            elif off < 0:
                shifted = jnp.concatenate(
                    [jnp.zeros((c, -off), feat.dtype), feat[:, :off]], axis=1)
            else:
                shifted = feat
            if dx == 1:
                shifted = jnp.where(mask_r, shifted, 0).astype(feat.dtype)
            elif dx == -1:
                shifted = jnp.where(mask_l, shifted, 0).astype(feat.dtype)
            taps.append(shifted)
    # Concat along sublanes at multiples of C (aligned): (9*C, HW) bf16.
    im2col = jnp.concatenate(taps, axis=0)

    # ---- single fused MXU matmul (K = 9*C) + bias + ReLU --------------------
    acc = jnp.dot(w_ref[...], im2col,
                  preferred_element_type=jnp.float32)      # (Cout, HW) f32
    acc = acc + b_ref[...]                                  # (Cout, 1) bcast
    o_ref[0] = jnp.maximum(acc, 0.0).astype(o_ref.dtype)


def seplus_forward(q_nchw, k_nchw, w_oihw, bias):
    """q: (B, Cq, H, W), k: (B, Ck, H, W), w: (Cout, Cq*Ck, 3, 3), bias: (Cout,).
    Returns (B, Cout, H, W) with the same semantics as the PyTorch module."""
    b, cq, h, w = q_nchw.shape
    ck = k_nchw.shape[1]
    cout = w_oihw.shape[0]
    c = cq * ck
    hw = h * w

    # Flatten spatial onto the lane axis: pure reshapes, no HBM transposes.
    q2 = q_nchw.reshape(b, cq, hw)
    k2 = k_nchw.reshape(b, ck, hw)

    # (Cout, C, 3, 3) -> (Cout, ky, kx, C) -> (Cout, 9*C).  K index =
    # (ky*3+kx)*C + cin matches the kernel's im2col ordering; cin = i*Ck + j
    # matches PyTorch's bcdhw -> b,(c*d),h,w reshape.  Constant, done once.
    wt = jnp.transpose(w_oihw, (0, 2, 3, 1)).reshape(cout, 9 * c)
    wt = wt.astype(jnp.bfloat16)
    b2 = bias.reshape(cout, 1).astype(jnp.float32)

    kernel = functools.partial(seplus_kernel, spatial=(h, w))

    out = pl.pallas_call(
        kernel,
        out_shape=jax.ShapeDtypeStruct((b, cout, hw), q_nchw.dtype),
        grid_spec=pltpu.PrefetchScalarGridSpec(
            num_scalar_prefetch=0,
            grid=(b,),
            in_specs=[
                pl.BlockSpec((1, cq, hw), lambda i: (i, 0, 0)),
                pl.BlockSpec((1, ck, hw), lambda i: (i, 0, 0)),
                pl.BlockSpec((cout, 9 * c), lambda i: (0, 0)),
                pl.BlockSpec((cout, 1), lambda i: (0, 0)),
            ],
            out_specs=pl.BlockSpec((1, cout, hw), lambda i: (i, 0, 0)),
        ),
        compiler_params=pltpu.CompilerParams(
            # Batch axis parallel -> both v7x TensorCores get work.
            dimension_semantics=("parallel",),
            # Explicit VMEM budget (well under v7x's 64 MiB physical).
            vmem_limit_bytes=32 * 1024 * 1024,
        ),
    )(q2, k2, wt, b2)

    return out.reshape(b, cout, h, w)


def seplus_reference(q_nchw, k_nchw, w_oihw, bias):
    """Plain-JAX reference of the PyTorch forward (for a sanity check)."""
    b, cq, h, w = q_nchw.shape
    ck = k_nchw.shape[1]
    feat = (q_nchw[:, :, None, :, :] * k_nchw[:, None, :, :, :]).reshape(
        b, cq * ck, h, w)
    out = jax.lax.conv_general_dilated(
        feat, w_oihw, window_strides=(1, 1), padding="SAME",
        dimension_numbers=("NCHW", "OIHW", "NCHW"))
    out = out + bias[None, :, None, None]
    return jnp.maximum(out, 0.0)


if __name__ == "__main__":
    B, CQ, CK, COUT, H, W = 2, 4, 4, 8, 16, 16

    key = jax.random.PRNGKey(0)
    kq, kk, kw, kb = jax.random.split(key, 4)
    q = jax.random.normal(kq, (B, CQ, H, W), jnp.float32)
    k = jax.random.normal(kk, (B, CK, H, W), jnp.float32)

    # Deterministic Conv2d params (PyTorch-style uniform fan-in scaling).
    fan_in = CQ * CK * 3 * 3
    bound = 1.0 / math.sqrt(fan_in)
    w_conv = jax.random.uniform(kw, (COUT, CQ * CK, 3, 3), jnp.float32,
                                minval=-bound, maxval=bound)
    b_conv = jax.random.uniform(kb, (COUT,), jnp.float32,
                                minval=-bound, maxval=bound)

    out = seplus_forward(q, k, w_conv, b_conv)
    out = jax.block_until_ready(out)

    ref = seplus_reference(q, k, w_conv, b_conv)
    assert out.shape == (B, COUT, H, W)
    # bf16 matmul inputs, f32 accumulation: errors stay well under 2e-2.
    err = float(jnp.max(jnp.abs(out - ref)))
    assert err < 2e-2, f"mismatch vs reference: max abs err {err}"

    print("KERNEL_OK")
</pallas_src>

<mosaic_0001>
module attributes {stable_mosaic.version = 11 : i64} {
  func.func @seplus_kernel(%arg0: i32, %arg1: memref<1x4x256xf32, #tpu.memory_space<vmem>>, %arg2: memref<1x4x256xf32, #tpu.memory_space<vmem>>, %arg3: memref<8x144xbf16, #tpu.memory_space<vmem>>, %arg4: memref<8x1xf32, #tpu.memory_space<vmem>>, %arg5: memref<1x8x256xf32, #tpu.memory_space<vmem>>) attributes {dimension_semantics = [#tpu.dimension_semantics<parallel>], iteration_bounds = array<i64: 2>, scalar_prefetch = 0 : i64, scratch_operands = 0 : i64, tpu.core_type = #tpu.core_type<tc>, window_params = [{transform_indices = @transform_0, window_bounds = array<i64: 1, 4, 256>}, {transform_indices = @transform_1, window_bounds = array<i64: 1, 4, 256>}, {pipeline_mode = #tpu.pipeline_mode<synchronous>, transform_indices = @transform_2, window_bounds = array<i64: 8, 144>}, {pipeline_mode = #tpu.pipeline_mode<synchronous>, transform_indices = @transform_3, window_bounds = array<i64: 8, 1>}, {transform_indices = @transform_4, window_bounds = array<i64: 1, 8, 256>}]} {
    %c0 = arith.constant 0 : index
    %c0_0 = arith.constant 0 : index
    %c0_1 = arith.constant 0 : index
    %0 = vector.load %arg1[%c0, %c0_0, %c0_1] : memref<1x4x256xf32, #tpu.memory_space<vmem>>, vector<1x4x256xf32>
    %1 = vector.shape_cast %0 : vector<1x4x256xf32> to vector<4x256xf32>
    %c0_2 = arith.constant 0 : index
    %c0_3 = arith.constant 0 : index
    %c0_4 = arith.constant 0 : index
    %2 = vector.load %arg2[%c0_2, %c0_3, %c0_4] : memref<1x4x256xf32, #tpu.memory_space<vmem>>, vector<1x4x256xf32>
    %3 = vector.shape_cast %2 : vector<1x4x256xf32> to vector<4x256xf32>
    %4 = vector.extract_strided_slice %1 {offsets = [0, 0], sizes = [1, 256], strides = [1, 1]} : vector<4x256xf32> to vector<1x256xf32>
    %5 = vector.broadcast %4 : vector<1x256xf32> to vector<4x256xf32>
    %6 = arith.mulf %5, %3 : vector<4x256xf32>
    %7 = vector.extract_strided_slice %1 {offsets = [1, 0], sizes = [1, 256], strides = [1, 1]} : vector<4x256xf32> to vector<1x256xf32>
    %8 = vector.broadcast %7 : vector<1x256xf32> to vector<4x256xf32>
    %9 = arith.mulf %8, %3 : vector<4x256xf32>
    %10 = vector.extract_strided_slice %1 {offsets = [2, 0], sizes = [1, 256], strides = [1, 1]} : vector<4x256xf32> to vector<1x256xf32>
    %11 = vector.broadcast %10 : vector<1x256xf32> to vector<4x256xf32>
    %12 = arith.mulf %11, %3 : vector<4x256xf32>
    %13 = vector.extract_strided_slice %1 {offsets = [3, 0], sizes = [1, 256], strides = [1, 1]} : vector<4x256xf32> to vector<1x256xf32>
    %14 = vector.broadcast %13 : vector<1x256xf32> to vector<4x256xf32>
    %15 = arith.mulf %14, %3 : vector<4x256xf32>
    %16 = tpu.concatenate %6, %9, %12, %15 in 0 : vector<4x256xf32>, vector<4x256xf32>, vector<4x256xf32>, vector<4x256xf32> -> vector<16x256xf32>
    %17 = arith.truncf %16 : vector<16x256xf32> to vector<16x256xbf16>
    %18 = tpu.iota {dimensions = array<i32: 1>} : vector<1x256xi32>
    %c16_i32 = arith.constant 16 : i32
    %c0_i32 = arith.constant 0 : i32
    %19 = arith.cmpi eq, %c16_i32, %c0_i32 : i32
    %c1_i32 = arith.constant 1 : i32
    %20 = arith.select %19, %c1_i32, %c16_i32 : i32
    %21 = vector.broadcast %20 : i32 to vector<1x256xi32>
    %22 = arith.remsi %18, %21 : vector<1x256xi32>
    %c0_i32_5 = arith.constant 0 : i32
    %23 = vector.broadcast %c0_i32_5 : i32 to vector<1x256xi32>
    %24 = arith.cmpi ne, %22, %23 : vector<1x256xi32>
    %c0_i32_6 = arith.constant 0 : i32
    %25 = vector.broadcast %c0_i32_6 : i32 to vector<1x256xi32>
    %26 = arith.cmpi slt, %22, %25 : vector<1x256xi32>
    %c0_i32_7 = arith.constant 0 : i32
    %27 = arith.cmpi slt, %20, %c0_i32_7 : i32
    %28 = vector.broadcast %27 : i1 to vector<1x256xi1>
    %29 = vector.broadcast %28 : vector<1x256xi1> to vector<1x256xi1>
    %30 = arith.xori %26, %29 : vector<1x256xi1>
    %31 = arith.andi %30, %24 : vector<1x256xi1>
    %32 = vector.broadcast %20 : i32 to vector<1x256xi32>
    %33 = arith.addi %22, %32 : vector<1x256xi32>
    %34 = arith.select %31, %33, %22 : vector<1x256xi1>, vector<1x256xi32>
    %c1_i32_8 = arith.constant 1 : i32
    %35 = vector.broadcast %c1_i32_8 : i32 to vector<1x256xi32>
    %36 = arith.cmpi sge, %34, %35 : vector<1x256xi32>
    %c14_i32 = arith.constant 14 : i32
    %37 = vector.broadcast %c14_i32 : i32 to vector<1x256xi32>
    %38 = arith.cmpi sle, %34, %37 : vector<1x256xi32>
    %cst = arith.constant 0.000000e+00 : bf16
    %39 = vector.broadcast %cst : bf16 to vector<16x17xbf16>
    %40 = vector.extract_strided_slice %17 {offsets = [0, 0], sizes = [16, 239], strides = [1, 1]} : vector<16x256xbf16> to vector<16x239xbf16>
    %41 = tpu.concatenate %39, %40 in 1 : vector<16x17xbf16>, vector<16x239xbf16> -> vector<16x256xbf16>
    %c0_i32_9 = arith.constant 0 : i32
    %42 = arith.sitofp %c0_i32_9 : i32 to bf16
    %43 = vector.shape_cast %36 : vector<1x256xi1> to vector<1x256xi1>
    %44 = vector.broadcast %43 : vector<1x256xi1> to vector<16x256xi1>
    %45 = vector.broadcast %42 : bf16 to vector<16x256xbf16>
    %46 = arith.select %44, %41, %45 : vector<16x256xi1>, vector<16x256xbf16>
    %cst_10 = arith.constant 0.000000e+00 : bf16
    %47 = vector.broadcast %cst_10 : bf16 to vector<16x16xbf16>
    %48 = vector.extract_strided_slice %17 {offsets = [0, 0], sizes = [16, 240], strides = [1, 1]} : vector<16x256xbf16> to vector<16x240xbf16>
    %49 = tpu.concatenate %47, %48 in 1 : vector<16x16xbf16>, vector<16x240xbf16> -> vector<16x256xbf16>
    %cst_11 = arith.constant 0.000000e+00 : bf16
    %50 = vector.broadcast %cst_11 : bf16 to vector<16x15xbf16>
    %51 = vector.extract_strided_slice %17 {offsets = [0, 0], sizes = [16, 241], strides = [1, 1]} : vector<16x256xbf16> to vector<16x241xbf16>
    %52 = tpu.concatenate %50, %51 in 1 : vector<16x15xbf16>, vector<16x241xbf16> -> vector<16x256xbf16>
    %c0_i32_12 = arith.constant 0 : i32
    %53 = arith.sitofp %c0_i32_12 : i32 to bf16
    %54 = vector.shape_cast %38 : vector<1x256xi1> to vector<1x256xi1>
    %55 = vector.broadcast %54 : vector<1x256xi1> to vector<16x256xi1>
    %56 = vector.broadcast %53 : bf16 to vector<16x256xbf16>
    %57 = arith.select %55, %52, %56 : vector<16x256xi1>, vector<16x256xbf16>
    %cst_13 = arith.constant 0.000000e+00 : bf16
    %58 = vector.broadcast %cst_13 : bf16 to vector<16x1xbf16>
    %59 = vector.extract_strided_slice %17 {offsets = [0, 0], sizes = [16, 255], strides = [1, 1]} : vector<16x256xbf16> to vector<16x255xbf16>
    %60 = tpu.concatenate %58, %59 in 1 : vector<16x1xbf16>, vector<16x255xbf16> -> vector<16x256xbf16>
    %c0_i32_14 = arith.constant 0 : i32
    %61 = arith.sitofp %c0_i32_14 : i32 to bf16
    %62 = vector.shape_cast %36 : vector<1x256xi1> to vector<1x256xi1>
    %63 = vector.broadcast %62 : vector<1x256xi1> to vector<16x256xi1>
    %64 = vector.broadcast %61 : bf16 to vector<16x256xbf16>
    %65 = arith.select %63, %60, %64 : vector<16x256xi1>, vector<16x256xbf16>
    %66 = vector.extract_strided_slice %17 {offsets = [0, 1], sizes = [16, 255], strides = [1, 1]} : vector<16x256xbf16> to vector<16x255xbf16>
    %cst_15 = arith.constant 0.000000e+00 : bf16
    %67 = vector.broadcast %cst_15 : bf16 to vector<16x1xbf16>
    %68 = tpu.concatenate %66, %67 in 1 : vector<16x255xbf16>, vector<16x1xbf16> -> vector<16x256xbf16>
    %c0_i32_16 = arith.constant 0 : i32
    %69 = arith.sitofp %c0_i32_16 : i32 to bf16
    %70 = vector.shape_cast %38 : vector<1x256xi1> to vector<1x256xi1>
    %71 = vector.broadcast %70 : vector<1x256xi1> to vector<16x256xi1>
    %72 = vector.broadcast %69 : bf16 to vector<16x256xbf16>
    %73 = arith.select %71, %68, %72 : vector<16x256xi1>, vector<16x256xbf16>
    %74 = vector.extract_strided_slice %17 {offsets = [0, 15], sizes = [16, 241], strides = [1, 1]} : vector<16x256xbf16> to vector<16x241xbf16>
    %cst_17 = arith.constant 0.000000e+00 : bf16
    %75 = vector.broadcast %cst_17 : bf16 to vector<16x15xbf16>
    %76 = tpu.concatenate %74, %75 in 1 : vector<16x241xbf16>, vector<16x15xbf16> -> vector<16x256xbf16>
    %c0_i32_18 = arith.constant 0 : i32
    %77 = arith.sitofp %c0_i32_18 : i32 to bf16
    %78 = vector.shape_cast %36 : vector<1x256xi1> to vector<1x256xi1>
    %79 = vector.broadcast %78 : vector<1x256xi1> to vector<16x256xi1>
    %80 = vector.broadcast %77 : bf16 to vector<16x256xbf16>
    %81 = arith.select %79, %76, %80 : vector<16x256xi1>, vector<16x256xbf16>
    %82 = vector.extract_strided_slice %17 {offsets = [0, 16], sizes = [16, 240], strides = [1, 1]} : vector<16x256xbf16> to vector<16x240xbf16>
    %cst_19 = arith.constant 0.000000e+00 : bf16
    %83 = vector.broadcast %cst_19 : bf16 to vector<16x16xbf16>
    %84 = tpu.concatenate %82, %83 in 1 : vector<16x240xbf16>, vector<16x16xbf16> -> vector<16x256xbf16>
    %85 = vector.extract_strided_slice %17 {offsets = [0, 17], sizes = [16, 239], strides = [1, 1]} : vector<16x256xbf16> to vector<16x239xbf16>
    %cst_20 = arith.constant 0.000000e+00 : bf16
    %86 = vector.broadcast %cst_20 : bf16 to vector<16x17xbf16>
    %87 = tpu.concatenate %85, %86 in 1 : vector<16x239xbf16>, vector<16x17xbf16> -> vector<16x256xbf16>
    %c0_i32_21 = arith.constant 0 : i32
    %88 = arith.sitofp %c0_i32_21 : i32 to bf16
    %89 = vector.shape_cast %38 : vector<1x256xi1> to vector<1x256xi1>
    %90 = vector.broadcast %89 : vector<1x256xi1> to vector<16x256xi1>
    %91 = vector.broadcast %88 : bf16 to vector<16x256xbf16>
    %92 = arith.select %90, %87, %91 : vector<16x256xi1>, vector<16x256xbf16>
    %93 = tpu.concatenate %46, %49, %57, %65, %17, %73, %81, %84, %92 in 0 : vector<16x256xbf16>, vector<16x256xbf16>, vector<16x256xbf16>, vector<16x256xbf16>, vector<16x256xbf16>, vector<16x256xbf16>, vector<16x256xbf16>, vector<16x256xbf16>, vector<16x256xbf16> -> vector<144x256xbf16>
    %c0_22 = arith.constant 0 : index
    %c0_23 = arith.constant 0 : index
    %94 = vector.load %arg3[%c0_22, %c0_23] : memref<8x144xbf16, #tpu.memory_space<vmem>>, vector<8x144xbf16>
    %cst_24 = arith.constant dense<0.000000e+00> : vector<8x256xf32>
    %95 = tpu.matmul %94, %93, %cst_24 {dimension_numbers = #tpu.dot_dimension_numbers<[1], [0], [0], [1], [0, 0, 1, 1], [], []>} : vector<8x144xbf16>, vector<144x256xbf16>, vector<8x256xf32> -> vector<8x256xf32>
    %c0_25 = arith.constant 0 : index
    %c0_26 = arith.constant 0 : index
    %96 = vector.load %arg4[%c0_25, %c0_26] : memref<8x1xf32, #tpu.memory_space<vmem>>, vector<8x1xf32>
    %97 = vector.broadcast %96 : vector<8x1xf32> to vector<8x256xf32>
    %98 = arith.addf %95, %97 : vector<8x256xf32>
    %cst_27 = arith.constant 0.000000e+00 : f32
    %99 = vector.broadcast %cst_27 : f32 to vector<8x256xf32>
    %100 = arith.maximumf %98, %99 : vector<8x256xf32>
    %c0_28 = arith.constant 0 : index
    %c0_29 = arith.constant 0 : index
    %c0_30 = arith.constant 0 : index
    %101 = vector.load %arg5[%c0_28, %c0_29, %c0_30] : memref<1x8x256xf32, #tpu.memory_space<vmem>>, vector<1x8x256xf32>
    %102 = vector.shape_cast %101 : vector<1x8x256xf32> to vector<8x256xf32>
    %103 = vector.shape_cast %100 : vector<8x256xf32> to vector<1x8x256xf32>
    tpu.vector_store %arg5[%c0_28, %c0_29, %c0_30], %103 {strides = array<i32>} : memref<1x8x256xf32, #tpu.memory_space<vmem>>, vector<1x8x256xf32>,
    return
  }
  func.func @transform_0(%arg0: i32) -> (i32, i32, i32) {
    %c0_i32 = arith.constant 0 : i32
    %c0_i32_0 = arith.constant 0 : i32
    %c0_i32_1 = arith.constant 0 : i32
    return %arg0, %c0_i32, %c0_i32_0 : i32, i32, i32
  }
  func.func @transform_1(%arg0: i32) -> (i32, i32, i32) {
    %c0_i32 = arith.constant 0 : i32
    %c0_i32_0 = arith.constant 0 : i32
    %c0_i32_1 = arith.constant 0 : i32
    return %arg0, %c0_i32, %c0_i32_0 : i32, i32, i32
  }
  func.func @transform_2(%arg0: i32) -> (i32, i32) {
    %c0_i32 = arith.constant 0 : i32
    %c0_i32_0 = arith.constant 0 : i32
    %c0_i32_1 = arith.constant 0 : i32
    return %c0_i32, %c0_i32_0 : i32, i32
  }
  func.func @transform_3(%arg0: i32) -> (i32, i32) {
    %c0_i32 = arith.constant 0 : i32
    %c0_i32_0 = arith.constant 0 : i32
    %c0_i32_1 = arith.constant 0 : i32
    return %c0_i32, %c0_i32_0 : i32, i32
  }
  func.func @transform_4(%arg0: i32) -> (i32, i32, i32) {
    %c0_i32 = arith.constant 0 : i32
    %c0_i32_0 = arith.constant 0 : i32
    %c0_i32_1 = arith.constant 0 : i32
    return %arg0, %c0_i32, %c0_i32_0 : i32, i32, i32
  }
}

</mosaic_0001>

<bundles_post_ra>
// kernel: tpu_custom_call.1
= control target key start
LH: loop header
LB: loop body
LE: loop exit
PB: predicated region body
PF: predicated region fallthrough
CT: control target
= control target key end

     0   :  { %9 = vsyncpa [#allocation3], 0  ;;  %s1244_s0 = inlined_call_operand.hbm [shape: f32[2,4,256], index: 0, kind: input, shape index: {}]   ;;  %s1245_s1 = inlined_call_operand.hbm [shape: f32[2,4,256], index: 1, kind: input, shape index: {}]   ;;  %s1246_s2 = inlined_call_operand.vmem [shape: bf16[8,144], index: 2, kind: input, shape index: {}]   ;;  %s1247_s3 = inlined_call_operand.vmem [shape: f32[8,1], index: 3, kind: input, shape index: {}]   ;;  %s1248_s4 = inlined_call_operand.hbm [shape: f32[2,8,256], index: 4, kind: output, shape index: {}]  }
   0x1   :  { %11 = vsyncpa [#allocation3 + $0x1], 0 }
   0x2   :  { %12 = vsyncpa [#allocation6], 0 }
   0x3   :  { %14 = vsyncpa [#allocation6 + $0x1], 0 }
   0x4   :  { %15 = vsyncpa [#allocation4], 0 }
   0x5   :  { %17 = vsyncpa [#allocation4 + $0x1], 0  ;;  %s955_s15 = smov 0   ;;  %s957_s16 = smov 0  }
   0x6   :  { %s959_s17 = smov 0   ;;  %s961_s18 = smov 0  }
   0x7 LB: > { %s976_s19 = sadd.s32 4294967295, %s916_s18   ;;  %s695_s20 = sadd.s32 4294967294, %s916_s18   ;;  %s916_s18 = sphi %s961_s18, %s1277_s18   ;;  %s912_s17 = sphi %s959_s17, %s1276_s17   ;;  %s908_s16 = sphi %s957_s16, %s1275_s16   ;;  %s904_s15 = sphi %s955_s15, %s1274_s15  }
   0x8   : > { %s980_s21 = sadd.s32 1, %s916_s18   ;;  %s30_s22 = sadd.s32 1, %s912_s17 }
   0x9   : > { %s27_s23 = ssub.s32 %s916_s18, %s980_s21  ;;  %p37_p0 = scmp.ne.s32.totalorder %s912_s17, %s908_s16 }
   0xa   : > { %p28_p1 = scmp.eq.s32.totalorder %s27_s23, 0  ;;  %p38_p2 = scmp.eq.s32.totalorder %s916_s18, 0 }
   0xb   : > { %p43_p3 = scmp.ne.s32.totalorder %s908_s16, %s904_s15  ;;  %p44_p4 = scmp.eq.s32.totalorder %s976_s19, 0 }
   0xc   : > { %s992_s24 = scalar_select %p28_p1, %s912_s17, %s30_s22  }
   0xd   : > { %p994_p5 = por %p38_p2, %p37_p0  ;;  %p998_p6 = por %p44_p4, %p43_p3 }
   0xe   : > { %p135_p7 = scmp.eq.s32.totalorder %s976_s19, 1  ;;  %p141_p8 = scmp.eq.s32.totalorder %s695_s20, 1 }
   0xf   : > { %s1252_s26 = scalar_select %p998_p6, 1, 0 }
  0x10   : > { %p745_p10 = scmp.lt.s32.totalorder %s916_s18, 2  ;;  %p1005_p11 = por %p135_p7, %p37_p0 }
  0x11   : > { %p1009_p12 = por %p141_p8, %p43_p3  ;;  %s1014_s29 = sand.u32 1, %s912_s17  }
  0x12   : > { %s1253_s27 = scalar_select %p1005_p11, 1, 0 }
  0x13   : > { %s1254_s28 = scalar_select %p1009_p12, 1, 0 }
  0x14   : > { %s725_s30 = sshll.u32 %s916_s18, 7  ;;  %s698_s5 = sshll.u32 %s1014_s29, 3 }
  0x15   : > { %s1023_s8 = scalar_lea.hbm %s1244_s0, %s725_s30  ;;  %s171_s9 = scalar_lea.vmem [#allocation2], %s698_s5 }
  0x16   : > { %s179_s10 = sshll.u32 %s171_s9, 4  ;;  %p1029_p13 = pnand %p745_p10, %p994_p5  ;;  %s1033_s10 = int_to_ptr.vmem [resolvable:$true] %s179_s10 }
  0x17   : > { %s168_s12 = scalar_lea.sflag [#allocation3], %s1014_s29  ;;  %s792_s13 = scalar_lea.hbm %s1023_s8, 128 }
  0x18   : > { %p793_p2 = scmp.ne.s32.totalorder %s1023_s8, %s792_s13  ;;  %p794_p3 = pneg %p1029_p13 }
  0x19   : > { %s797_s22 = scalar_lea.hbm %s1244_s0, 256  ;;  %p798_p5 = scmp.lt.s32.totalorder %s1023_s8, %s1244_s0 }
  0x1a   : > { %p795_p4 = pnand %p794_p3, %p793_p2  ;;  %p799_p8 = scmp.lt.s32.totalorder %s797_s22, %s792_s13 }
  0x1c   : > { %p796_p7 = pneg %p795_p4  ;;  %p800_p10 = por %p799_p8, %p798_p5 }
  0x1e   : > { %p801_p9 = pnand %p800_p10, %p796_p7 }
  0x20   : > { %804 = shalt.err (!%p801_p9)
}
  0x21   : > { %s805_s6 = scalar_lea.vmem %s1033_s10, 128  ;;  %s918_s7 = smov [#allocation2]  }
  0x22   : > { %p806_p0 = scmp.ne.s32.totalorder %s1033_s10, %s805_s6  ;;  %s810_s9 = sshll.u32 %s918_s7, 4  ;;  %s811_s9 = int_to_ptr.vmem [resolvable:$false] %s810_s9 }
  0x23   : > { %s812_s14 = scalar_lea.vmem %s811_s9, 256  ;;  %p813_p1 = scmp.lt.s32.totalorder %s1033_s10, %s811_s9 }
  0x24   : > { %p808_p2 = pnand %p806_p0, %p794_p3  ;;  %p814_p12 = scmp.lt.s32.totalorder %s812_s14, %s805_s6 }
  0x26   : > { %p809_p4 = pneg %p808_p2  ;;  %p815_p11 = por %p814_p12, %p813_p1 }
  0x28   : > { %p816_p5 = pnand %p815_p11, %p809_p4 }
  0x2a   : > { %819 = shalt.err (!%p816_p5)
}
  0x2b   : > { %737 = dma.hbm_to_vmem [thread:$0]  (!%p1029_p13), %s1023_s8, 128, %s1033_s10, %s168_s12  }
  0x2c   : > { %p1256_p9 = scmp.lt.s32.totalorder %s916_s18, 3  ;;  %p1257_p0 = scmp.ge.s32.totalorder %s916_s18, 1 }
  0x2d   : > { %s1075_s23 = scalar_lea.hbm %s1245_s1, %s725_s30  ;;  %s190_s25 = scalar_lea.vmem [#allocation5], %s698_s5 }
  0x2e   : > { %p1066_p7 = pnand %p1257_p0, %p1256_p9  ;;  %s198_s6 = sshll.u32 %s190_s25, 4  ;;  %s199_s6 = int_to_ptr.vmem [resolvable:$true] %s198_s6 }
  0x2f   : > { %s187_s8 = scalar_lea.sflag [#allocation6], %s1014_s29  ;;  %s820_s10 = scalar_lea.hbm %s1075_s23, 128 }
  0x30   : > { %s1258_s13 = scalar_select %p1066_p7, 1, 0 }
  0x31   : > { %p821_p11 = scmp.ne.s32.totalorder %s1075_s23, %s820_s10  ;;  %s825_s9 = scalar_lea.hbm %s1245_s1, 256 }
  0x32   : > { %p826_p8 = scmp.lt.s32.totalorder %s1075_s23, %s1245_s1  ;;  %p827_p10 = scmp.lt.s32.totalorder %s825_s9, %s820_s10 }
  0x33   : > { %p823_p12 = pnand %p821_p11, %p794_p3 }
  0x34   : > { %p828_p2 = por %p827_p10, %p826_p8 }
  0x35   : > { %p824_p1 = pneg %p823_p12 }
  0x37   : > { %p829_p4 = pnand %p828_p2, %p824_p1 }
  0x39   : > { %832 = shalt.err (!%p829_p4)
}
  0x3a   : > { %s833_s5 = scalar_lea.vmem %s199_s6, 128  ;;  %s919_s29 = smov [#allocation5]  }
  0x3b   : > { %p834_p5 = scmp.ne.s32.totalorder %s199_s6, %s833_s5  ;;  %s838_s20 = sshll.u32 %s919_s29, 4  ;;  %s839_s20 = int_to_ptr.vmem [resolvable:$false] %s838_s20 }
  0x3c   : > { %s840_s22 = scalar_lea.vmem %s839_s20, 256  ;;  %p841_p11 = scmp.lt.s32.totalorder %s199_s6, %s839_s20 }
  0x3d   : > { %p836_p9 = pnand %p834_p5, %p794_p3  ;;  %p842_p12 = scmp.lt.s32.totalorder %s840_s22, %s833_s5 }
  0x3f   : > { %p837_p0 = pneg %p836_p9  ;;  %p843_p6 = por %p842_p12, %p841_p11 }
  0x41   : > { %p844_p7 = pnand %p843_p6, %p837_p0 }
  0x43   : > { %847 = shalt.err (!%p844_p7)
}
  0x44   : > { %740 = dma.hbm_to_vmem [thread:$0]  (!%p1029_p13), %s1075_s23, 128, %s199_s6, %s187_s8  }
  0x45   : > { %p1259_p1 = scmp.ne.s32.totalorder %s1258_s13, 0 }
  0x46   : > { %s1101_s25 = sand.u32 (!%p1259_p1), 1, %s908_s16   ;;  %p1260_p3 = scmp.ne.s32.totalorder (!%p1259_p1), %s1252_s26, 0 }
  0x47   : > { %207 = sbr.rel (%p1259_p1) target bundleno = 464 (0x1d0), region = 36  ;;  %s705_s10 = sshll.u32 (!%p1259_p1), %s1101_s25, 3 }
  0x48   : > { %s210_s12 = scalar_lea.sflag (!%p1259_p1), [#allocation3], %s1101_s25  ;;  %s213_s7 = scalar_lea.vmem (!%p1259_p1), [#allocation2], %s705_s10 }
  0x4c   : > { %891 = dma.done.wait (%p1260_p3), %s210_s12, 128  }
  0x4d   : > { %893 = vsyncadd (%p1260_p3), %s210_s12, 4294967168  ;;  %s219_s11 = scalar_lea.sflag [#allocation6], %s1101_s25  ;;  %s222_s23 = scalar_lea.vmem [#allocation5], %s705_s10 }
  0x4e   : > { %895 = dma.done.wait (%p1260_p3), %s219_s11, 128  }
  0x4f   : > { %897 = vsyncadd (%p1260_p3), %s219_s11, 4294967168  ;;  %v258_v0 = vlaneseq  ;;  %v255_v10 = vld [vmem:[%s213_s7] sm:$0xff]  ;;  %v920_v14 = vmov 0   ;;  %v256_v15 = vld [vmem:[%s222_s23] sm:$0xff]  ;;  %vm353_vm0 = vcmask 1043456   ;;  %s921_s26 = smov 113  }
  0x50   : > { %788 = vset.pattern.permute.xlu0 %v920_v14  ;;  %v277_v21 = vcombine.high %v256_v15, %v256_v15  ;;  %s922_s13 = smov 112   ;;  %s923_s6 = smov 127   ;;  %v1147_v59 = vld [vmem:[%s1246_s2] sm:$0xff]  ;;  %vm427_vm7 = vcmask 130048   ;;  %vm506_vm8 = vcmask 916480   ;;  %vm493_vm9 = vcmask 924672  }
  0x51   : > { %v259_v1 = vshrl.u32 %v258_v0, 7  ;;  %v361_v2 = vand.u32 127, %v258_v0  ;;  %s924_s8 = smov 1   ;;  %s925_s9 = smov 15   ;;  %v709_v60 = vcombine.high %v1147_v59, %v1147_v59  ;;  %v527_v61 = vld [vmem:[%s1247_s3] sm:$0xff]  ;;  %vm480_vm12 = vcmask 1039360  }
  0x52   : > { %s926_s30 = smov 16   ;;  %s927_s29 = smov 17   ;;  %vm467_vm15 = vcmask 7168  }
  0x53   : > { %v1114_v3 = vsub.s32 0, %v259_v1  ;;  %v283_v4 = vsub.s32 1, %v259_v1  ;;  %v303_v5 = vsub.s32 2, %v259_v1  ;;  %v323_v6 = vsub.s32 3, %v259_v1  ;;  %719 = vmatprep.mubr.msk.bf16.mxu0 %vm427_vm7, %v709_v60  ;;  %s928_s20 = smov 111   ;;  %s707_s12 = sshll.u32 %s1101_s25, 4 }
  0x54   : > { %v1116_v7 = vsub.s32 4, %v259_v1  ;;  %v287_v8 = vsub.s32 5, %v259_v1  ;;  %v307_v9 = vsub.s32 6, %v259_v1  ;;  %v327_v11 = vsub.s32 7, %v259_v1  ;;  %s727_s7 = sshll.u32 %s976_s19, 8  ;;  %s251_s11 = scalar_lea.vmem [#allocation7], %s707_s12 }
  0x55   : > { %v362_v12 = vadd.s32 128, %v361_v2  ;;  %v367_v13 = vand.u32 15, %v361_v2  ;;  %v261_v16 = vrot.slane %v255_v10, %v1114_v3  ;;  %v284_v17 = vrot.slane %v255_v10, %v283_v4  ;;  %s602_s23 = sshll.u32 %s251_s11, 4  ;;  %p1271_p13 = scmp.ne.s32.totalorder %s1253_s27, 0  ;;  %s603_s23 = int_to_ptr.vmem [resolvable:$true] %s602_s23 }
  0x56   : > { %v304_v18 = vrot.slane %v255_v10, %v303_v5  ;;  %v324_v19 = vrot.slane %v255_v10, %v323_v6  ;;  %v265_v20 = vrot.slane %v255_v10, %v1116_v7  ;;  %v288_v22 = vrot.slane %v255_v10, %v287_v8  ;;  %s929_s19 = smov [#allocation7]  }
  0x57   : > { %v308_v23 = vrot.slane %v255_v10, %v307_v9  ;;  %v271_v24 = vrot.slane %v261_v16, %v1114_v3  ;;  %v294_v25 = vrot.slane %v284_v17, %v283_v4  ;;  %v328_v31 = vrot.slane %v255_v10, %v327_v11 }
  0x58   : > { %v314_v26 = vrot.slane %v304_v18, %v303_v5  ;;  %v334_v27 = vrot.slane %v324_v19, %v323_v6  ;;  %v275_v28 = vrot.slane %v265_v20, %v1114_v3  ;;  %v298_v29 = vrot.slane %v288_v22, %v283_v4 }
  0x59   : > { %v318_v30 = vrot.slane %v308_v23, %v303_v5  ;;  %v279_v32 = vmul.f32 %v271_v24, %v256_v15  ;;  %v299_v33 = vmul.f32 %v294_v25, %v256_v15  ;;  %v338_v38 = vrot.slane %v328_v31, %v323_v6 }
  0x5a   : > { %v319_v34 = vmul.f32 %v314_v26, %v256_v15  ;;  %v339_v35 = vmul.f32 %v334_v27, %v256_v15  ;;  %v280_v36 = vmul.f32 %v277_v21, %v275_v28  ;;  %v300_v37 = vmul.f32 %v298_v29, %v277_v21 }
  0x5b   : > { %v343_v39 = vrot.slane %v299_v33, 4  ;;  %v374_v41 = vand.u32 15, %v362_v12  ;;  %v320_v42 = vmul.f32 %v318_v30, %v277_v21  ;;  %v340_v43 = vmul.f32 %v338_v38, %v277_v21 }
  0x5c   : > { %v349_v40 = vrot.slane %v339_v35, 4  ;;  %v344_v44 = vrot.slane %v300_v37, 4  ;;  %vm387_vm1 = vcmp.ge.s32.totalorder %v367_v13, 1  ;;  %vm1124_vm3 = vcmp.le.s32.totalorder %v367_v13, 14 }
  0x5d   : > { %v354_v45 = vsel %vm353_vm0, %v279_v32, %v343_v39  ;;  %vm388_vm2 = vcmp.ge.s32.totalorder %v374_v41, 1  ;;  %v350_v49 = vrot.slane %v340_v43, 4  ;;  %vm390_vm5 = vcmp.le.s32.totalorder %v374_v41, 14 }
  0x5e   : > { %v356_v46 = vsel %vm353_vm0, %v319_v34, %v349_v40  ;;  %v355_v50 = vsel %vm353_vm0, %v280_v36, %v344_v44  ;;  %vm409_vm4 = vmpackc.low %vm388_vm2, %vm387_vm1  ;;  %vm397_vm1 = vcmask 138240   ;;  %v708_v38 = vcombine.low %v1147_v59, %v1147_v59 }
  0x5f   : > { %v1128_v48 = vpack.c.bf16 %v356_v46, %v354_v45  ;;  %v410_v51 = vsel %vm409_vm4, 65537, %v920_v14  ;;  %vm449_vm6 = vmpackc.low %vm390_vm5, %vm1124_vm3  ;;  %v357_v52 = vsel %vm353_vm0, %v320_v42, %v350_v49  ;;  %vm438_vm0 = vcmask 121856  }
  0x60   : > { %v418_v53 = vrot.slane %v410_v51, %v1116_v7  ;;  %v414_v54 = vrot.slane %v410_v51, %v1114_v3  ;;  %v450_v55 = vsel %vm449_vm6, 65537, %v920_v14  ;;  %v359_v56 = vpack.c.bf16 %v357_v52, %v355_v50  ;;  %vm715_vm2 = vmneg %vm427_vm7 }
  0x61   : > { %489 = vrot.lane.b32.xlu1 %v1128_v48, %s921_s26  ;;  %502 = vrot.lane.b32.xlu0 %v1128_v48, %s922_s13  ;;  %v458_v57 = vrot.slane %v450_v55, %v1116_v7  ;;  %v454_v58 = vrot.slane %v450_v55, %v1114_v3  ;;  %vm517_vm3 = vcmask 908288  }
  0x62   : > { %vm1157_vm10 = vcmp.ne.s16.totalorder %v418_v53, 0  ;;  %vm1161_vm11 = vcmp.ne.s16.totalorder %v414_v54, 0 }
  0x63   : > { %vm1167_vm13 = vcmp.ne.s16.totalorder %v458_v57, 0  ;;  %vm1171_vm14 = vcmp.ne.s16.totalorder %v454_v58, 0 }
  0x65   : > { %491 = vrot.lane.b32.xlu1 %v359_v56, %s921_s26  ;;  %504 = vrot.lane.b32.xlu0 %v359_v56, %s922_s13 }
  0x69   : > { %478 = vrot.lane.b32.xlu1 %v359_v56, %s923_s6  ;;  %476 = vrot.lane.b32.xlu0 %v1128_v48, %s923_s6  ;;  %s1207_s6 = scalar_lea.hbm %s1248_s4, %s727_s7 }
  0x6d   : > { %465 = vrot.lane.b32.xlu1 %v359_v56, %s924_s8  ;;  %463 = vrot.lane.b32.xlu0 %v1128_v48, %s924_s8  ;;  %s588_s8 = scalar_lea.sflag [#allocation4], %s1101_s25 }
  0x71   : > { %436 = vrot.lane.b32.xlu1 %v359_v56, %s925_s9  ;;  %434 = vrot.lane.b32.xlu0 %v1128_v48, %s925_s9  ;;  %s848_s9 = scalar_lea.vmem %s603_s23, 256 }
  0x72   : > { %p849_p6 = scmp.ne.s32.totalorder %s603_s23, %s848_s9 }
  0x74   : > { %p850_p7 = pnand %p849_p6, %p1271_p13 }
  0x75   : > { %425 = vrot.lane.b32.xlu1 %v359_v56, %s926_s30  ;;  %423 = vrot.lane.b32.xlu0 %v1128_v48, %s926_s30  ;;  %s852_s30 = sshll.u32 %s929_s19, 4  ;;  %s853_s30 = int_to_ptr.vmem [resolvable:$false] %s852_s30 }
  0x76   : > { %p851_p8 = pneg %p850_p7  ;;  %s854_s14 = scalar_lea.vmem %s853_s30, 512 }
  0x77   : > { %p855_p10 = scmp.lt.s32.totalorder %s603_s23, %s853_s30  ;;  %p856_p2 = scmp.lt.s32.totalorder %s854_s14, %s848_s9 }
  0x79   : > { %395 = vrot.lane.b32.xlu1 %v359_v56, %s927_s29  ;;  %393 = vrot.lane.b32.xlu0 %v1128_v48, %s927_s29  ;;  %p857_p4 = por %p856_p2, %p855_p10 }
  0x7b   : > { %p858_p5 = pnand %p857_p4, %p851_p8 }
  0x7d   : > { %515 = vrot.lane.b32.xlu1 %v359_v56, %s928_s20  ;;  %513 = vrot.lane.b32.xlu0 %v1128_v48, %s928_s20 }
  0x81   : > { %530 = vperm.xlu0 %788, %v527_v61  }
  0xd3   : > { %v490_v62 = vpop.permute.xlu1 %489  ;;  %v503_v63 = vpop.permute.xlu0 %502 }
  0xd7   : > { %v492_v0 = vpop.permute.xlu1 %491  ;;  %v505_v1 = vpop.permute.xlu0 %504 }
  0xd8   : > { %v498_v3 = vsel %vm493_vm9, %v492_v0, 0  ;;  %710 = vmatprep.subr.msk.bf16.mxu0 %vm506_vm8, %v505_v1  ;;  %v507_v4 = vsel %vm506_vm8, %v503_v63, %v505_v1  ;;  %v494_v5 = vsel %vm493_vm9, %v490_v62, %v492_v0 }
  0xd9   : > { %543 = vmatpush1.bf16.msra.mxu0 %v507_v4  ;;  %v500_v11 = vsel %vm1161_vm11, %v494_v5, 0 }
  0xda   : > { %711 = vmatprep.subr.msk.bf16.mxu0 %vm1157_vm10, %v498_v3 }
  0xdb   : > { %v479_v7 = vpop.permute.xlu1 %478  ;;  %v477_v8 = vpop.permute.xlu0 %476 }
  0xdc   : > { %v485_v12 = vsel %vm480_vm12, %v479_v7, 0  ;;  %v481_v13 = vsel %vm480_vm12, %v477_v8, %v479_v7 }
  0xdd   : > { %545 = vmatpush1.bf16.msra.mxu0 %v500_v11  ;;  %v487_v14 = vsel %vm1171_vm14, %v481_v13, 0 }
  0xde   : > { %712 = vmatprep.subr.msk.bf16.mxu0 %vm1167_vm13, %v485_v12 }
  0xdf   : > { %v466_v15 = vpop.permute.xlu1 %465  ;;  %v464_v16 = vpop.permute.xlu0 %463 }
  0xe0   : > { %v468_v17 = vsel %vm467_vm15, %v464_v16, %v466_v15  ;;  %v472_v18 = vsel %vm467_vm15, 0, %v464_v16 }
  0xe1   : > { %547 = vmatpush1.bf16.msra.mxu0 %v487_v14  ;;  %v474_v21 = vsel %vm1161_vm11, %v472_v18, 0 }
  0xe2   : > { %548 = vmatprep.subr.bf16.mxu0 %v359_v56 }
  0xe3   : > { %v437_v19 = vpop.permute.xlu1 %436  ;;  %v435_v20 = vpop.permute.xlu0 %434 }
  0xe4   : > { %v439_v22 = vsel %vm438_vm0, %v435_v20, %v437_v19  ;;  %v443_v23 = vsel %vm438_vm0, 0, %v435_v20 }
  0xe5   : > { %549 = vmatpush1.bf16.msra.mxu0 %v1128_v48  ;;  %v461_v26 = vsel %vm1171_vm14, %v443_v23, 0 }
  0xe6   : > { %713 = vmatprep.subr.msk.bf16.mxu0 %vm1157_vm10, %v468_v17 }
  0xe7   : > { %v426_v24 = vpop.permute.xlu1 %425  ;;  %v424_v25 = vpop.permute.xlu0 %423 }
  0xe8   : > { %v428_v27 = vsel %vm427_vm7, %v424_v25, %v426_v24 }
  0xe9   : > { %551 = vmatpush1.bf16.msra.mxu0 %v474_v21 }
  0xea   : > { %714 = vmatprep.subr.msk.bf16.mxu0 %vm1167_vm13, %v439_v22 }
  0xeb   : > { %v396_v28 = vpop.permute.xlu1 %395  ;;  %v394_v29 = vpop.permute.xlu0 %393 }
  0xec   : > { %v398_v30 = vsel %vm397_vm1, %v394_v29, %v396_v28  ;;  %v403_v31 = vsel %vm397_vm1, 0, %v394_v29 }
  0xed   : > { %553 = vmatpush1.bf16.msra.mxu0 %v461_v26  ;;  %v421_v34 = vsel %vm1161_vm11, %v403_v31, 0 }
  0xee   : > { %554 = vmatprep.subr.bf16.mxu0 %v428_v27 }
  0xef   : > { %v516_v32 = vpop.permute.xlu1 %515  ;;  %v514_v33 = vpop.permute.xlu0 %513 }
  0xf0   : > { %v522_v35 = vsel %vm517_vm3, %v516_v32, 0  ;;  %v518_v36 = vsel %vm517_vm3, %v514_v33, %v516_v32 }
  0xf1   : > { %716 = vmatpush1.bf16.msk.msra.mxu0 %vm715_vm2, %v424_v25  ;;  %v524_v37 = vsel %vm1171_vm14, %v518_v36, 0 }
  0xf2   : > { %717 = vmatprep.subr.msk.bf16.mxu0 %vm1157_vm10, %v398_v30 }
  0xf5   : > { %557 = vmatpush1.bf16.msra.mxu0 %v421_v34 }
  0xf6   : > { %718 = vmatprep.subr.msk.bf16.mxu0 %vm1167_vm13, %v522_v35 }
  0xf9   : > { %573 = vmatpush2.bf16.msra.mxu0 %v524_v37 }
  0xfc   : > { %575 = vmatmul.mubr.bf16.vlgmr.msra.gmra.mxu0 %v708_v38  ;;  %v531_v39 = vpop.permute.xlu0 %530 }
 0x1bc   : > { %v576_v40 = vpop.f32.mrf.mxu0 }
 0x1bd   : > { %v577_v41 = vadd.f32 %v576_v40, %v531_v39 }
 0x1be   : > { %v578_v42 = vpop.f32.mrf.mxu0 }
 0x1bf   : > { %v583_v43 = vmax.f32 %v577_v41, 0.0  ;;  %v579_v44 = vadd.f32 %v578_v42, %v531_v39 }
 0x1c0   : > { %v580_v45 = vpop.f32.mrf.mxu0 }
 0x1c1   : > { %585 = vst [vmem:[%s251_s11] sm:$0xff] %v583_v43  ;;  %v584_v46 = vmax.f32 %v579_v44, 0.0 }
 0x1c2   : > { %v581_v47 = vpop.f32.mrf.mxu0 }
 0x1c3   : > { %586 = vst [vmem:[%s251_s11 + $0x8] sm:$0xff] %v584_v46 }
 0x1c4   : > { %861 = shalt.err (!%p858_p5)
}
 0x1c5   : > { %s862_s5 = scalar_lea.hbm %s1207_s6, 256  ;;  %s866_s20 = scalar_lea.hbm %s1248_s4, 512 }
 0x1c6   : > { %p863_p9 = scmp.ne.s32.totalorder %s1207_s6, %s862_s5  ;;  %p867_p12 = scmp.lt.s32.totalorder %s1207_s6, %s1248_s4 }
 0x1c7   : > { %p868_p1 = scmp.lt.s32.totalorder %s866_s20, %s862_s5 }
 0x1c8   : > { %p864_p0 = pnand %p863_p9, %p1271_p13 }
 0x1c9   : > { %p869_p3 = por %p868_p1, %p867_p12 }
 0x1ca   : > { %p865_p11 = pneg %p864_p0 }
 0x1cc   : > { %p870_p6 = pnand %p869_p3, %p865_p11 }
 0x1ce   : > { %873 = shalt.err (!%p870_p6)
}
 0x1cf   : > { %732 = dma.vmem_to_hbm [thread:$0]  (%p1271_p13), %s603_s23, 256, %s1207_s6, %s588_s8  }
 0x1d0 PF: > { %s614_s12 = sand.u32 1, %s904_s15   ;;  %p1272_p7 = scmp.ne.s32.totalorder %s1254_s28, 0 }
 0x1d1   : > { %p1273_p8 = scmp.ge.s32.totalorder %s916_s18, 2  ;;  %s615_s7 = scalar_lea.sflag [#allocation4], %s614_s12 }
 0x1d3   : > { %p742_p10 = pnand %p1273_p8, %p1272_p7 }
 0x1d5   : > { %p743_p2 = pneg %p742_p10 }
 0x1d7   : > { %899 = dma.done.wait (%p743_p2), %s615_s7, 256  }
 0x1d8   : > { %901 = vsyncadd (%p743_p2), %s615_s7, 4294967040  ;;  %p20_p4 = scmp.ge.s32.totalorder %s980_s21, 4   ;;  %s1274_s15 = smov %s908_s16 }
 0x1d9   : > { %s1275_s16 = smov %s912_s17  ;;  %s1276_s17 = smov %s992_s24 }
 0x1da   : > { %s1277_s18 = smov %s980_s21  ;;  %22 = sbr.rel (!%p20_p4) target bundleno = 7 (0x7), region = 94 }
 0x1df   :  { %620 = vsyncpa [#allocation3], 1 }
 0x1e0   :  { %622 = vsyncpa [#allocation3 + $0x1], 1 }
 0x1e1   :  { %623 = vsyncpa [#allocation6], 1 }
 0x1e2   :  { %625 = vsyncpa [#allocation6 + $0x1], 1 }
 0x1e3   :  { %626 = vsyncpa [#allocation4], 1 }
 0x1e4   :  { %628 = vsyncpa [#allocation4 + $0x1], 1 }

</bundles_post_ra>
